<compile_context>
chip_gen: v6e
topology: v6e:2x2x1
jax: 0.10.0
libtpu: 0.0.40
codegen_flags: <defaults>
</compile_context>

<pallas_src>
import functools
import math

import jax
import jax.numpy as jnp
from jax.experimental import pallas as pl
from jax.experimental.pallas import tpu as pltpu

LANE = 128      # time frames padded to a multiple of this (lane-dense stores)
SUBLANE = 8     # f32 sublane packing for channel dims


def _round_up(v: int, m: int) -> int:
    return ((v + m - 1) // m) * m


def _pad_to(a, shape):
    pads = [(0, s - d) for d, s in zip(a.shape, shape)]
    return jnp.pad(a, pads)


def _vmem_limit_bytes() -> int:
    """Use most of the physical VMEM (128 MiB on v5e/v6e, 64 MiB on v7x)."""
    try:
        info = pltpu.get_tpu_info()
        cap = getattr(info, "vmem_capacity_bytes", None)
        if cap:
            return int(cap * 3 // 4)
    except Exception:
        pass
    return 48 * 1024 * 1024


def _compiler_params():
    return pltpu.CompilerParams(
        dimension_semantics=("parallel",),      # batch grid -> both TCs on v7x
        vmem_limit_bytes=_vmem_limit_bytes(),
    )


@functools.lru_cache(maxsize=None)
def _roll_is_np_convention() -> bool:
    """Probe pltpu.roll once: True if result[t] = x[t - shift] (np.roll convention)."""
    try:
        def k(x_ref, o_ref):
            o_ref[...] = pltpu.roll(x_ref[...], 1, axis=1)
        x = jnp.broadcast_to(jnp.arange(128, dtype=jnp.float32), (8, 128))
        y = pl.pallas_call(
            k, out_shape=jax.ShapeDtypeStruct((8, 128), jnp.float32))(x)
        return bool(y[0, 0] == 127.0)
    except Exception:
        return True


# ---------------------------------------------------------------------------
# Fused single-stage kernel
# ---------------------------------------------------------------------------

def _stage_kernel(x_ref, vmask_ref, w_in_ref, b_in_ref, wd_ref, bd_ref,
                  wi_ref, bi_ref, w_out_ref, b_out_ref, o_ref, acc_ref, *,
                  dilations, n_real_in, activation, roll_np):
    """Whole SingleStageTCN for one batch element, activation resident in VMEM.

      x' = activation(x)                              (softmax / sigmoid / none)
      a  = W_in @ x' + b_in
      for each layer l (dilation d):
          h = relu(Wd_stack[l] @ [a[t-d]; a[t]; a[t+d]] + bd[l])
          a = a + Wi[l] @ h + bi[l]                   (dropout == identity)
      out = W_out @ a + b_out
    """
    x = x_ref[0].astype(jnp.float32)                       # (Cin_p, Tp)
    vmask = vmask_ref[...].astype(jnp.float32)             # (1, Tp), 1 on real frames
    cin, tp = x.shape

    # --- fused inter-stage activation over channels -------------------------
    if activation == "softmax":
        if cin > n_real_in:   # exclude zero-padded channels from the normalizer
            chan = jax.lax.broadcasted_iota(jnp.int32, (cin, tp), 0)
            x = jnp.where(chan < n_real_in, x, -1e30)
        mx = jnp.max(x, axis=0, keepdims=True)
        e = jnp.exp(x - mx)
        x = e / jnp.sum(e, axis=0, keepdims=True)
    elif activation == "sigmoid":
        x = 1.0 / (1.0 + jnp.exp(-x))

    # --- conv_in (1x1) -------------------------------------------------------
    h0 = jnp.dot(w_in_ref[...].astype(jnp.float32), x,
                 preferred_element_type=jnp.float32) + b_in_ref[...]
    acc_ref[...] = h0 * vmask                              # padded frames stay exact 0

    lane = jax.lax.broadcasted_iota(jnp.int32, (1, tp), 1)

    # --- dilated residual layers (unrolled; weights resident in VMEM) --------
    for l, d in enumerate(dilations):
        xl = acc_ref[...]                                  # (C, Tp) f32
        if d < tp:
            m_prev = (lane >= d).astype(jnp.float32)       # zero lanes wrapped by roll
            m_next = (lane < tp - d).astype(jnp.float32)
            r_a = pltpu.roll(xl, d, axis=1)
            r_b = pltpu.roll(xl, tp - d, axis=1)
            if roll_np:                                    # r_a[t] = xl[t - d]
                x_prev, x_next = r_a * m_prev, r_b * m_next
            else:                                          # opposite convention
                x_prev, x_next = r_b * m_prev, r_a * m_next
        else:                                              # whole tap out of range
            x_prev = jnp.zeros_like(xl)
            x_next = jnp.zeros_like(xl)

        x_stack = jnp.concatenate([x_prev, xl, x_next], axis=0)      # (3C, Tp)
        h = jnp.dot(wd_ref[l].astype(jnp.float32), x_stack,
                    preferred_element_type=jnp.float32) + bd_ref[l]
        h = jnp.maximum(h, 0.0)                            # ReLU fused in VMEM
        # TODO(synk): dropout is identity (eval mode).
        y = jnp.dot(wi_ref[l].astype(jnp.float32), h,
                    preferred_element_type=jnp.float32) + bi_ref[l]
        acc_ref[...] = (xl + y) * vmask                    # residual + tail re-zero

    # --- conv_out (1x1) -------------------------------------------------------
    logits = jnp.dot(w_out_ref[...].astype(jnp.float32), acc_ref[...],
                     preferred_element_type=jnp.float32) + b_out_ref[...]
    o_ref[0] = (logits * vmask).astype(o_ref.dtype)


def run_stage(x, vmask, sp, *, activation, n_real_in, roll_np):
    """x: (N, Cin_p, Tp) -> (N, Ncls_p, Tp); one fused pallas_call per stage."""
    n, cin_p, tp = x.shape
    c = sp["w_in"].shape[0]
    ncp = sp["w_out"].shape[0]
    num_layers = sp["wd"].shape[0]

    kernel = functools.partial(
        _stage_kernel, dilations=sp["dilations"], n_real_in=n_real_in,
        activation=activation, roll_np=roll_np)

    return pl.pallas_call(
        kernel,
        out_shape=jax.ShapeDtypeStruct((n, ncp, tp), x.dtype),
        grid_spec=pltpu.PrefetchScalarGridSpec(
            num_scalar_prefetch=0,
            grid=(n,),
            in_specs=[
                pl.BlockSpec((1, cin_p, tp), lambda i: (i, 0, 0)),
                pl.BlockSpec((1, tp), lambda i: (0, 0)),
                pl.BlockSpec((c, cin_p), lambda i: (0, 0)),
                pl.BlockSpec((c, 1), lambda i: (0, 0)),
                pl.BlockSpec((num_layers, c, 3 * c), lambda i: (0, 0, 0)),
                pl.BlockSpec((num_layers, c, 1), lambda i: (0, 0, 0)),
                pl.BlockSpec((num_layers, c, c), lambda i: (0, 0, 0)),
                pl.BlockSpec((num_layers, c, 1), lambda i: (0, 0, 0)),
                pl.BlockSpec((ncp, c), lambda i: (0, 0)),
                pl.BlockSpec((ncp, 1), lambda i: (0, 0)),
            ],
            out_specs=pl.BlockSpec((1, ncp, tp), lambda i: (i, 0, 0)),
            scratch_shapes=[pltpu.VMEM((c, tp), jnp.float32)],
        ),
        compiler_params=_compiler_params(),
    )(x, vmask, sp["w_in"], sp["b_in"], sp["wd"], sp["bd"],
      sp["wi"], sp["bi"], sp["w_out"], sp["b_out"])


# ---------------------------------------------------------------------------
# Parameter preparation (pad + stack once, outside the kernels)
# ---------------------------------------------------------------------------

def prepare_params(params, c_in, n_classes):
    cin_p = max(_round_up(c_in, SUBLANE), SUBLANE)
    ncp = max(_round_up(n_classes, SUBLANE), SUBLANE)

    def prep_stage(p, in_pad):
        n_feat = p["conv_in_w"].shape[0]
        cf = max(_round_up(n_feat, SUBLANE), SUBLANE)
        wd, bd, wi, bi, dil = [], [], [], [], []
        for layer in p["layers"]:
            dil.append(int(layer["dilation"]))
            wd3 = _pad_to(layer["wd"], (3, cf, cf))                  # (3, C, C)
            # Stack the 3 taps along the contraction dim -> one K=3C matmul.
            wd.append(jnp.concatenate([wd3[0], wd3[1], wd3[2]], axis=1))
            bd.append(_pad_to(layer["bd"], (cf, 1)))
            wi.append(_pad_to(layer["wi"], (cf, cf)))
            bi.append(_pad_to(layer["bi"], (cf, 1)))
        return dict(
            w_in=_pad_to(p["conv_in_w"], (cf, in_pad)),
            b_in=_pad_to(p["conv_in_b"], (cf, 1)),
            wd=jnp.stack(wd), bd=jnp.stack(bd),
            wi=jnp.stack(wi), bi=jnp.stack(bi),
            w_out=_pad_to(p["conv_out_w"], (ncp, cf)),
            b_out=_pad_to(p["conv_out_b"], (ncp, 1)),
            dilations=tuple(dil),
        )

    return dict(
        stage1=prep_stage(params["stage1"], cin_p),
        stages=[prep_stage(sp, ncp) for sp in params["stages"]],
    )


# ---------------------------------------------------------------------------
# Model forward
# ---------------------------------------------------------------------------

def multi_stage_tcn(x, params, *, n_classes):
    """x: (N, C_in, T). Returns list of per-stage logits, each (N, n_classes, T)."""
    n, c_in, t = x.shape
    tp = max(_round_up(t, LANE), LANE)
    cin_p = max(_round_up(c_in, SUBLANE), SUBLANE)
    xp = jnp.pad(x, ((0, 0), (0, cin_p - c_in), (0, tp - t)))
    vmask = (jnp.arange(tp, dtype=jnp.int32) < t).astype(x.dtype).reshape(1, tp)

    prepared = prepare_params(params, c_in, n_classes)
    roll_np = _roll_is_np_convention()

    outputs = []
    out = run_stage(xp, vmask, prepared["stage1"],
                    activation="none", n_real_in=c_in, roll_np=roll_np)
    outputs.append(out[:, :n_classes, :t])

    act = "sigmoid" if n_classes == 1 else "softmax"
    for sp in prepared["stages"]:
        out = run_stage(out, vmask, sp,
                        activation=act, n_real_in=n_classes, roll_np=roll_np)
        outputs.append(out[:, :n_classes, :t])
    return outputs


# ---------------------------------------------------------------------------
# Parameter init + pure-JAX reference
# ---------------------------------------------------------------------------

def _init_stage(key, c_in, n_features, n_classes, n_layers):
    k_in, k_out, k_layers = jax.random.split(key, 3)

    def dense(k, co, ci, scale):
        kw, kb = jax.random.split(k)
        return (scale * jax.random.normal(kw, (co, ci), jnp.float32),
                scale * jax.random.normal(kb, (co, 1), jnp.float32))

    w_in, b_in = dense(k_in, n_features, c_in, 0.5 / math.sqrt(c_in))
    layers = []
    for i, lk in enumerate(jax.random.split(k_layers, n_layers)):
        k1, k2, k3, k4 = jax.random.split(lk, 4)
        s = 0.3 / math.sqrt(n_features)
        layers.append(dict(
            dilation=2 ** i,
            wd=s * jax.random.normal(k1, (3, n_features, n_features), jnp.float32),
            bd=s * jax.random.normal(k2, (n_features, 1), jnp.float32),
            wi=s * jax.random.normal(k3, (n_features, n_features), jnp.float32),
            bi=s * jax.random.normal(k4, (n_features, 1), jnp.float32),
        ))
    w_out, b_out = dense(k_out, n_classes, n_features, 0.5 / math.sqrt(n_features))
    return dict(conv_in_w=w_in, conv_in_b=b_in, layers=layers,
                conv_out_w=w_out, conv_out_b=b_out)


def init_params(key, c_in, n_features, n_classes, n_stages, n_layers):
    keys = jax.random.split(key, n_stages)
    return dict(
        stage1=_init_stage(keys[0], c_in, n_features, n_classes, n_layers),
        stages=[_init_stage(k, n_classes, n_features, n_classes, n_layers)
                for k in keys[1:]],
    )


_HI = jax.lax.Precision.HIGHEST


def _ref_conv1x1(x, w, b):
    return jnp.einsum("oc,nct->not", w, x, precision=_HI) + b[None]


def _ref_dilated_conv3(x, w3, b, d):
    n, c, t = x.shape
    xp = jnp.pad(x, ((0, 0), (0, 0), (d, d)))
    taps = [xp[:, :, 0:t], xp[:, :, d:d + t], xp[:, :, 2 * d:2 * d + t]]
    out = b[None]
    for k in range(3):
        out = out + jnp.einsum("oc,nct->not", w3[k], taps[k], precision=_HI)
    return out


def _ref_stage(x, p):
    out = _ref_conv1x1(x, p["conv_in_w"], p["conv_in_b"])
    for layer in p["layers"]:
        h = jnp.maximum(
            _ref_dilated_conv3(out, layer["wd"], layer["bd"], layer["dilation"]), 0.0)
        h = _ref_conv1x1(h, layer["wi"], layer["bi"])
        out = out + h
    return _ref_conv1x1(out, p["conv_out_w"], p["conv_out_b"])


def _ref_forward(x, params, n_classes):
    outs = [_ref_stage(x, params["stage1"])]
    for sp in params["stages"]:
        prev = outs[-1]
        act = (jax.nn.sigmoid(prev) if n_classes == 1
               else jax.nn.softmax(prev, axis=1))
        outs.append(_ref_stage(act, sp))
    return outs


# ---------------------------------------------------------------------------
# Demo / self-check
# ---------------------------------------------------------------------------

if __name__ == "__main__":
    key = jax.random.PRNGKey(0)
    k_x, k_p = jax.random.split(key)

    # Small MS-TCN: batch=2, in_channel=4, T=16, n_features=8, n_classes=8,
    # n_stages=2, n_layers=3 (paper uses 64 features / 4 stages / 10 layers).
    N, C_IN, T = 2, 4, 16
    N_FEATURES, N_CLASSES, N_STAGES, N_LAYERS = 8, 8, 2, 3

    x = jax.random.normal(k_x, (N, C_IN, T), dtype=jnp.float32)
    params = init_params(k_p, C_IN, N_FEATURES, N_CLASSES, N_STAGES, N_LAYERS)

    outs = multi_stage_tcn(x, params, n_classes=N_CLASSES)
    outs = [jax.block_until_ready(o) for o in outs]

    refs = _ref_forward(x, params, N_CLASSES)
    assert len(outs) == N_STAGES
    for o, r in zip(outs, refs):
        assert o.shape == (N, N_CLASSES, T) and o.dtype == x.dtype
        err = float(jnp.max(jnp.abs(o - r)))
        # Tolerance allows for MXU pass-precision differences vs the XLA reference;
        # semantic errors (wrong taps/shift/residual) would be O(0.1-1).
        assert err < 2e-2, f"max abs err vs reference = {err}"

    print("KERNEL_OK")
</pallas_src>

<mosaic_0001>
module attributes {stable_mosaic.version = 11 : i64} {
  func.func @k(%arg0: memref<8x128xf32, #tpu.memory_space<vmem>>, %arg1: memref<8x128xf32, #tpu.memory_space<vmem>>) attributes {dimension_semantics = [], scalar_prefetch = 0 : i64, scratch_operands = 0 : i64, tpu.core_type = #tpu.core_type<tc>} {
    %c0 = arith.constant 0 : index
    %c0_0 = arith.constant 0 : index
    %0 = vector.load %arg0[%c0, %c0_0] : memref<8x128xf32, #tpu.memory_space<vmem>>, vector<8x128xf32>
    %c1_i32 = arith.constant 1 : i32
    %1 = tpu.dynamic_rotate %0 by %c1_i32 dim 1 : vector<8x128xf32>, i32 -> vector<8x128xf32>
    %c0_1 = arith.constant 0 : index
    %c0_2 = arith.constant 0 : index
    %2 = vector.load %arg1[%c0_1, %c0_2] : memref<8x128xf32, #tpu.memory_space<vmem>>, vector<8x128xf32>
    tpu.vector_store %arg1[%c0_1, %c0_2], %1 {strides = array<i32>} : memref<8x128xf32, #tpu.memory_space<vmem>>, vector<8x128xf32>,
    return
  }
}

module attributes {stable_mosaic.version = 11 : i64} {
  func.func @_stage_kernel(%arg0: i32, %arg1: memref<1x8x128xf32, #tpu.memory_space<vmem>>, %arg2: memref<1x128xf32, #tpu.memory_space<vmem>>, %arg3: memref<8x8xf32, #tpu.memory_space<vmem>>, %arg4: memref<8x1xf32, #tpu.memory_space<vmem>>, %arg5: memref<3x8x24xf32, #tpu.memory_space<vmem>>, %arg6: memref<3x8x1xf32, #tpu.memory_space<vmem>>, %arg7: memref<3x8x8xf32, #tpu.memory_space<vmem>>, %arg8: memref<3x8x1xf32, #tpu.memory_space<vmem>>, %arg9: memref<8x8xf32, #tpu.memory_space<vmem>>, %arg10: memref<8x1xf32, #tpu.memory_space<vmem>>, %arg11: memref<1x8x128xf32, #tpu.memory_space<vmem>>, %arg12: memref<8x128xf32, #tpu.memory_space<vmem>>) attributes {dimension_semantics = [#tpu.dimension_semantics<parallel>], iteration_bounds = array<i64: 2>, scalar_prefetch = 0 : i64, scratch_operands = 1 : i64, tpu.core_type = #tpu.core_type<tc>, window_params = [{transform_indices = @transform_0, window_bounds = array<i64: 1, 8, 128>}, {pipeline_mode = #tpu.pipeline_mode<synchronous>, transform_indices = @transform_1, window_bounds = array<i64: 1, 128>}, {pipeline_mode = #tpu.pipeline_mode<synchronous>, transform_indices = @transform_2, window_bounds = array<i64: 8, 8>}, {pipeline_mode = #tpu.pipeline_mode<synchronous>, transform_indices = @transform_3, window_bounds = array<i64: 8, 1>}, {pipeline_mode = #tpu.pipeline_mode<synchronous>, transform_indices = @transform_4, window_bounds = array<i64: 3, 8, 24>}, {pipeline_mode = #tpu.pipeline_mode<synchronous>, transform_indices = @transform_5, window_bounds = array<i64: 3, 8, 1>}, {pipeline_mode = #tpu.pipeline_mode<synchronous>, transform_indices = @transform_6, window_bounds = array<i64: 3, 8, 8>}, {pipeline_mode = #tpu.pipeline_mode<synchronous>, transform_indices = @transform_7, window_bounds = array<i64: 3, 8, 1>}, {pipeline_mode = #tpu.pipeline_mode<synchronous>, transform_indices = @transform_8, window_bounds = array<i64: 8, 8>}, {pipeline_mode = #tpu.pipeline_mode<synchronous>, transform_indices = @transform_9, window_bounds = array<i64: 8, 1>}, {transform_indices = @transform_10, window_bounds = array<i64: 1, 8, 128>}]} {
    %c0 = arith.constant 0 : index
    %c0_0 = arith.constant 0 : index
    %c0_1 = arith.constant 0 : index
    %0 = vector.load %arg1[%c0, %c0_0, %c0_1] : memref<1x8x128xf32, #tpu.memory_space<vmem>>, vector<1x8x128xf32>
    %1 = vector.shape_cast %0 : vector<1x8x128xf32> to vector<8x128xf32>
    %c0_2 = arith.constant 0 : index
    %c0_3 = arith.constant 0 : index
    %2 = vector.load %arg2[%c0_2, %c0_3] : memref<1x128xf32, #tpu.memory_space<vmem>>, vector<1x128xf32>
    %c0_4 = arith.constant 0 : index
    %c0_5 = arith.constant 0 : index
    %3 = vector.load %arg3[%c0_4, %c0_5] : memref<8x8xf32, #tpu.memory_space<vmem>>, vector<8x8xf32>
    %cst = arith.constant dense<0.000000e+00> : vector<8x128xf32>
    %4 = tpu.matmul %3, %1, %cst {dimension_numbers = #tpu.dot_dimension_numbers<[1], [0], [0], [1], [0, 0, 1, 1], [], []>} : vector<8x8xf32>, vector<8x128xf32>, vector<8x128xf32> -> vector<8x128xf32>
    %c0_6 = arith.constant 0 : index
    %c0_7 = arith.constant 0 : index
    %5 = vector.load %arg4[%c0_6, %c0_7] : memref<8x1xf32, #tpu.memory_space<vmem>>, vector<8x1xf32>
    %6 = vector.broadcast %5 : vector<8x1xf32> to vector<8x128xf32>
    %7 = arith.addf %4, %6 : vector<8x128xf32>
    %8 = vector.broadcast %2 : vector<1x128xf32> to vector<8x128xf32>
    %9 = arith.mulf %7, %8 : vector<8x128xf32>
    %c0_8 = arith.constant 0 : index
    %c0_9 = arith.constant 0 : index
    %10 = vector.load %arg12[%c0_8, %c0_9] : memref<8x128xf32, #tpu.memory_space<vmem>>, vector<8x128xf32>
    tpu.vector_store %arg12[%c0_8, %c0_9], %9 {strides = array<i32>} : memref<8x128xf32, #tpu.memory_space<vmem>>, vector<8x128xf32>,
    %11 = tpu.iota {dimensions = array<i32: 1>} : vector<1x128xi32>
    %c0_10 = arith.constant 0 : index
    %c0_11 = arith.constant 0 : index
    %12 = vector.load %arg12[%c0_10, %c0_11] : memref<8x128xf32, #tpu.memory_space<vmem>>, vector<8x128xf32>
    %c1_i32 = arith.constant 1 : i32
    %13 = vector.broadcast %c1_i32 : i32 to vector<1x128xi32>
    %14 = arith.cmpi sge, %11, %13 : vector<1x128xi32>
    %15 = arith.extui %14 : vector<1x128xi1> to vector<1x128xi32>
    %16 = arith.sitofp %15 : vector<1x128xi32> to vector<1x128xf32>
    %c127_i32 = arith.constant 127 : i32
    %17 = vector.broadcast %c127_i32 : i32 to vector<1x128xi32>
    %18 = arith.cmpi slt, %11, %17 : vector<1x128xi32>
    %19 = arith.extui %18 : vector<1x128xi1> to vector<1x128xi32>
    %20 = arith.sitofp %19 : vector<1x128xi32> to vector<1x128xf32>
    %c1_i32_12 = arith.constant 1 : i32
    %21 = tpu.dynamic_rotate %12 by %c1_i32_12 dim 1 : vector<8x128xf32>, i32 -> vector<8x128xf32>
    %c127_i32_13 = arith.constant 127 : i32
    %22 = tpu.dynamic_rotate %12 by %c127_i32_13 dim 1 : vector<8x128xf32>, i32 -> vector<8x128xf32>
    %23 = vector.broadcast %16 : vector<1x128xf32> to vector<8x128xf32>
    %24 = arith.mulf %21, %23 : vector<8x128xf32>
    %25 = vector.broadcast %20 : vector<1x128xf32> to vector<8x128xf32>
    %26 = arith.mulf %22, %25 : vector<8x128xf32>
    %27 = tpu.concatenate %24, %12, %26 in 0 : vector<8x128xf32>, vector<8x128xf32>, vector<8x128xf32> -> vector<24x128xf32>
    %c0_14 = arith.constant 0 : index
    %c0_15 = arith.constant 0 : index
    %c0_16 = arith.constant 0 : index
    %28 = vector.load %arg5[%c0_14, %c0_15, %c0_16] : memref<3x8x24xf32, #tpu.memory_space<vmem>>, vector<1x8x24xf32>
    %29 = vector.shape_cast %28 : vector<1x8x24xf32> to vector<8x24xf32>
    %cst_17 = arith.constant dense<0.000000e+00> : vector<8x128xf32>
    %30 = tpu.matmul %29, %27, %cst_17 {dimension_numbers = #tpu.dot_dimension_numbers<[1], [0], [0], [1], [0, 0, 1, 1], [], []>} : vector<8x24xf32>, vector<24x128xf32>, vector<8x128xf32> -> vector<8x128xf32>
    %c0_18 = arith.constant 0 : index
    %c0_19 = arith.constant 0 : index
    %c0_20 = arith.constant 0 : index
    %31 = vector.load %arg6[%c0_18, %c0_19, %c0_20] : memref<3x8x1xf32, #tpu.memory_space<vmem>>, vector<1x8x1xf32>
    %32 = vector.shape_cast %31 : vector<1x8x1xf32> to vector<8x1xf32>
    %33 = vector.broadcast %32 : vector<8x1xf32> to vector<8x128xf32>
    %34 = arith.addf %30, %33 : vector<8x128xf32>
    %cst_21 = arith.constant 0.000000e+00 : f32
    %35 = vector.broadcast %cst_21 : f32 to vector<8x128xf32>
    %36 = arith.maximumf %34, %35 : vector<8x128xf32>
    %c0_22 = arith.constant 0 : index
    %c0_23 = arith.constant 0 : index
    %c0_24 = arith.constant 0 : index
    %37 = vector.load %arg7[%c0_22, %c0_23, %c0_24] : memref<3x8x8xf32, #tpu.memory_space<vmem>>, vector<1x8x8xf32>
    %38 = vector.shape_cast %37 : vector<1x8x8xf32> to vector<8x8xf32>
    %cst_25 = arith.constant dense<0.000000e+00> : vector<8x128xf32>
    %39 = tpu.matmul %38, %36, %cst_25 {dimension_numbers = #tpu.dot_dimension_numbers<[1], [0], [0], [1], [0, 0, 1, 1], [], []>} : vector<8x8xf32>, vector<8x128xf32>, vector<8x128xf32> -> vector<8x128xf32>
    %c0_26 = arith.constant 0 : index
    %c0_27 = arith.constant 0 : index
    %c0_28 = arith.constant 0 : index
    %40 = vector.load %arg8[%c0_26, %c0_27, %c0_28] : memref<3x8x1xf32, #tpu.memory_space<vmem>>, vector<1x8x1xf32>
    %41 = vector.shape_cast %40 : vector<1x8x1xf32> to vector<8x1xf32>
    %42 = vector.broadcast %41 : vector<8x1xf32> to vector<8x128xf32>
    %43 = arith.addf %39, %42 : vector<8x128xf32>
    %44 = arith.addf %12, %43 : vector<8x128xf32>
    %45 = vector.broadcast %2 : vector<1x128xf32> to vector<8x128xf32>
    %46 = arith.mulf %44, %45 : vector<8x128xf32>
    %c0_29 = arith.constant 0 : index
    %c0_30 = arith.constant 0 : index
    %47 = vector.load %arg12[%c0_29, %c0_30] : memref<8x128xf32, #tpu.memory_space<vmem>>, vector<8x128xf32>
    tpu.vector_store %arg12[%c0_29, %c0_30], %46 {strides = array<i32>} : memref<8x128xf32, #tpu.memory_space<vmem>>, vector<8x128xf32>,
    %c0_31 = arith.constant 0 : index
    %c0_32 = arith.constant 0 : index
    %48 = vector.load %arg12[%c0_31, %c0_32] : memref<8x128xf32, #tpu.memory_space<vmem>>, vector<8x128xf32>
    %c2_i32 = arith.constant 2 : i32
    %49 = vector.broadcast %c2_i32 : i32 to vector<1x128xi32>
    %50 = arith.cmpi sge, %11, %49 : vector<1x128xi32>
    %51 = arith.extui %50 : vector<1x128xi1> to vector<1x128xi32>
    %52 = arith.sitofp %51 : vector<1x128xi32> to vector<1x128xf32>
    %c126_i32 = arith.constant 126 : i32
    %53 = vector.broadcast %c126_i32 : i32 to vector<1x128xi32>
    %54 = arith.cmpi slt, %11, %53 : vector<1x128xi32>
    %55 = arith.extui %54 : vector<1x128xi1> to vector<1x128xi32>
    %56 = arith.sitofp %55 : vector<1x128xi32> to vector<1x128xf32>
    %c2_i32_33 = arith.constant 2 : i32
    %57 = tpu.dynamic_rotate %48 by %c2_i32_33 dim 1 : vector<8x128xf32>, i32 -> vector<8x128xf32>
    %c126_i32_34 = arith.constant 126 : i32
    %58 = tpu.dynamic_rotate %48 by %c126_i32_34 dim 1 : vector<8x128xf32>, i32 -> vector<8x128xf32>
    %59 = vector.broadcast %52 : vector<1x128xf32> to vector<8x128xf32>
    %60 = arith.mulf %57, %59 : vector<8x128xf32>
    %61 = vector.broadcast %56 : vector<1x128xf32> to vector<8x128xf32>
    %62 = arith.mulf %58, %61 : vector<8x128xf32>
    %63 = tpu.concatenate %60, %48, %62 in 0 : vector<8x128xf32>, vector<8x128xf32>, vector<8x128xf32> -> vector<24x128xf32>
    %c1 = arith.constant 1 : index
    %c0_35 = arith.constant 0 : index
    %c0_36 = arith.constant 0 : index
    %64 = vector.load %arg5[%c1, %c0_35, %c0_36] : memref<3x8x24xf32, #tpu.memory_space<vmem>>, vector<1x8x24xf32>
    %65 = vector.shape_cast %64 : vector<1x8x24xf32> to vector<8x24xf32>
    %cst_37 = arith.constant dense<0.000000e+00> : vector<8x128xf32>
    %66 = tpu.matmul %65, %63, %cst_37 {dimension_numbers = #tpu.dot_dimension_numbers<[1], [0], [0], [1], [0, 0, 1, 1], [], []>} : vector<8x24xf32>, vector<24x128xf32>, vector<8x128xf32> -> vector<8x128xf32>
    %c1_38 = arith.constant 1 : index
    %c0_39 = arith.constant 0 : index
    %c0_40 = arith.constant 0 : index
    %67 = vector.load %arg6[%c1_38, %c0_39, %c0_40] : memref<3x8x1xf32, #tpu.memory_space<vmem>>, vector<1x8x1xf32>
    %68 = vector.shape_cast %67 : vector<1x8x1xf32> to vector<8x1xf32>
    %69 = vector.broadcast %68 : vector<8x1xf32> to vector<8x128xf32>
    %70 = arith.addf %66, %69 : vector<8x128xf32>
    %cst_41 = arith.constant 0.000000e+00 : f32
    %71 = vector.broadcast %cst_41 : f32 to vector<8x128xf32>
    %72 = arith.maximumf %70, %71 : vector<8x128xf32>
    %c1_42 = arith.constant 1 : index
    %c0_43 = arith.constant 0 : index
    %c0_44 = arith.constant 0 : index
    %73 = vector.load %arg7[%c1_42, %c0_43, %c0_44] : memref<3x8x8xf32, #tpu.memory_space<vmem>>, vector<1x8x8xf32>
    %74 = vector.shape_cast %73 : vector<1x8x8xf32> to vector<8x8xf32>
    %cst_45 = arith.constant dense<0.000000e+00> : vector<8x128xf32>
    %75 = tpu.matmul %74, %72, %cst_45 {dimension_numbers = #tpu.dot_dimension_numbers<[1], [0], [0], [1], [0, 0, 1, 1], [], []>} : vector<8x8xf32>, vector<8x128xf32>, vector<8x128xf32> -> vector<8x128xf32>
    %c1_46 = arith.constant 1 : index
    %c0_47 = arith.constant 0 : index
    %c0_48 = arith.constant 0 : index
    %76 = vector.load %arg8[%c1_46, %c0_47, %c0_48] : memref<3x8x1xf32, #tpu.memory_space<vmem>>, vector<1x8x1xf32>
    %77 = vector.shape_cast %76 : vector<1x8x1xf32> to vector<8x1xf32>
    %78 = vector.broadcast %77 : vector<8x1xf32> to vector<8x128xf32>
    %79 = arith.addf %75, %78 : vector<8x128xf32>
    %80 = arith.addf %48, %79 : vector<8x128xf32>
    %81 = vector.broadcast %2 : vector<1x128xf32> to vector<8x128xf32>
    %82 = arith.mulf %80, %81 : vector<8x128xf32>
    %c0_49 = arith.constant 0 : index
    %c0_50 = arith.constant 0 : index
    %83 = vector.load %arg12[%c0_49, %c0_50] : memref<8x128xf32, #tpu.memory_space<vmem>>, vector<8x128xf32>
    tpu.vector_store %arg12[%c0_49, %c0_50], %82 {strides = array<i32>} : memref<8x128xf32, #tpu.memory_space<vmem>>, vector<8x128xf32>,
    %c0_51 = arith.constant 0 : index
    %c0_52 = arith.constant 0 : index
    %84 = vector.load %arg12[%c0_51, %c0_52] : memref<8x128xf32, #tpu.memory_space<vmem>>, vector<8x128xf32>
    %c4_i32 = arith.constant 4 : i32
    %85 = vector.broadcast %c4_i32 : i32 to vector<1x128xi32>
    %86 = arith.cmpi sge, %11, %85 : vector<1x128xi32>
    %87 = arith.extui %86 : vector<1x128xi1> to vector<1x128xi32>
    %88 = arith.sitofp %87 : vector<1x128xi32> to vector<1x128xf32>
    %c124_i32 = arith.constant 124 : i32
    %89 = vector.broadcast %c124_i32 : i32 to vector<1x128xi32>
    %90 = arith.cmpi slt, %11, %89 : vector<1x128xi32>
    %91 = arith.extui %90 : vector<1x128xi1> to vector<1x128xi32>
    %92 = arith.sitofp %91 : vector<1x128xi32> to vector<1x128xf32>
    %c4_i32_53 = arith.constant 4 : i32
    %93 = tpu.dynamic_rotate %84 by %c4_i32_53 dim 1 : vector<8x128xf32>, i32 -> vector<8x128xf32>
    %c124_i32_54 = arith.constant 124 : i32
    %94 = tpu.dynamic_rotate %84 by %c124_i32_54 dim 1 : vector<8x128xf32>, i32 -> vector<8x128xf32>
    %95 = vector.broadcast %88 : vector<1x128xf32> to vector<8x128xf32>
    %96 = arith.mulf %93, %95 : vector<8x128xf32>
    %97 = vector.broadcast %92 : vector<1x128xf32> to vector<8x128xf32>
    %98 = arith.mulf %94, %97 : vector<8x128xf32>
    %99 = tpu.concatenate %96, %84, %98 in 0 : vector<8x128xf32>, vector<8x128xf32>, vector<8x128xf32> -> vector<24x128xf32>
    %c2 = arith.constant 2 : index
    %c0_55 = arith.constant 0 : index
    %c0_56 = arith.constant 0 : index
    %100 = vector.load %arg5[%c2, %c0_55, %c0_56] : memref<3x8x24xf32, #tpu.memory_space<vmem>>, vector<1x8x24xf32>
    %101 = vector.shape_cast %100 : vector<1x8x24xf32> to vector<8x24xf32>
    %cst_57 = arith.constant dense<0.000000e+00> : vector<8x128xf32>
    %102 = tpu.matmul %101, %99, %cst_57 {dimension_numbers = #tpu.dot_dimension_numbers<[1], [0], [0], [1], [0, 0, 1, 1], [], []>} : vector<8x24xf32>, vector<24x128xf32>, vector<8x128xf32> -> vector<8x128xf32>
    %c2_58 = arith.constant 2 : index
    %c0_59 = arith.constant 0 : index
    %c0_60 = arith.constant 0 : index
    %103 = vector.load %arg6[%c2_58, %c0_59, %c0_60] : memref<3x8x1xf32, #tpu.memory_space<vmem>>, vector<1x8x1xf32>
    %104 = vector.shape_cast %103 : vector<1x8x1xf32> to vector<8x1xf32>
    %105 = vector.broadcast %104 : vector<8x1xf32> to vector<8x128xf32>
    %106 = arith.addf %102, %105 : vector<8x128xf32>
    %cst_61 = arith.constant 0.000000e+00 : f32
    %107 = vector.broadcast %cst_61 : f32 to vector<8x128xf32>
    %108 = arith.maximumf %106, %107 : vector<8x128xf32>
    %c2_62 = arith.constant 2 : index
    %c0_63 = arith.constant 0 : index
    %c0_64 = arith.constant 0 : index
    %109 = vector.load %arg7[%c2_62, %c0_63, %c0_64] : memref<3x8x8xf32, #tpu.memory_space<vmem>>, vector<1x8x8xf32>
    %110 = vector.shape_cast %109 : vector<1x8x8xf32> to vector<8x8xf32>
    %cst_65 = arith.constant dense<0.000000e+00> : vector<8x128xf32>
    %111 = tpu.matmul %110, %108, %cst_65 {dimension_numbers = #tpu.dot_dimension_numbers<[1], [0], [0], [1], [0, 0, 1, 1], [], []>} : vector<8x8xf32>, vector<8x128xf32>, vector<8x128xf32> -> vector<8x128xf32>
    %c2_66 = arith.constant 2 : index
    %c0_67 = arith.constant 0 : index
    %c0_68 = arith.constant 0 : index
    %112 = vector.load %arg8[%c2_66, %c0_67, %c0_68] : memref<3x8x1xf32, #tpu.memory_space<vmem>>, vector<1x8x1xf32>
    %113 = vector.shape_cast %112 : vector<1x8x1xf32> to vector<8x1xf32>
    %114 = vector.broadcast %113 : vector<8x1xf32> to vector<8x128xf32>
    %115 = arith.addf %111, %114 : vector<8x128xf32>
    %116 = arith.addf %84, %115 : vector<8x128xf32>
    %117 = vector.broadcast %2 : vector<1x128xf32> to vector<8x128xf32>
    %118 = arith.mulf %116, %117 : vector<8x128xf32>
    %c0_69 = arith.constant 0 : index
    %c0_70 = arith.constant 0 : index
    %119 = vector.load %arg12[%c0_69, %c0_70] : memref<8x128xf32, #tpu.memory_space<vmem>>, vector<8x128xf32>
    tpu.vector_store %arg12[%c0_69, %c0_70], %118 {strides = array<i32>} : memref<8x128xf32, #tpu.memory_space<vmem>>, vector<8x128xf32>,
    %c0_71 = arith.constant 0 : index
    %c0_72 = arith.constant 0 : index
    %120 = vector.load %arg9[%c0_71, %c0_72] : memref<8x8xf32, #tpu.memory_space<vmem>>, vector<8x8xf32>
    %c0_73 = arith.constant 0 : index
    %c0_74 = arith.constant 0 : index
    %121 = vector.load %arg12[%c0_73, %c0_74] : memref<8x128xf32, #tpu.memory_space<vmem>>, vector<8x128xf32>
    %cst_75 = arith.constant dense<0.000000e+00> : vector<8x128xf32>
    %122 = tpu.matmul %120, %121, %cst_75 {dimension_numbers = #tpu.dot_dimension_numbers<[1], [0], [0], [1], [0, 0, 1, 1], [], []>} : vector<8x8xf32>, vector<8x128xf32>, vector<8x128xf32> -> vector<8x128xf32>
    %c0_76 = arith.constant 0 : index
    %c0_77 = arith.constant 0 : index
    %123 = vector.load %arg10[%c0_76, %c0_77] : memref<8x1xf32, #tpu.memory_space<vmem>>, vector<8x1xf32>
    %124 = vector.broadcast %123 : vector<8x1xf32> to vector<8x128xf32>
    %125 = arith.addf %122, %124 : vector<8x128xf32>
    %126 = vector.broadcast %2 : vector<1x128xf32> to vector<8x128xf32>
    %127 = arith.mulf %125, %126 : vector<8x128xf32>
    %c0_78 = arith.constant 0 : index
    %c0_79 = arith.constant 0 : index
    %c0_80 = arith.constant 0 : index
    %128 = vector.load %arg11[%c0_78, %c0_79, %c0_80] : memref<1x8x128xf32, #tpu.memory_space<vmem>>, vector<1x8x128xf32>
    %129 = vector.shape_cast %128 : vector<1x8x128xf32> to vector<8x128xf32>
    %130 = vector.shape_cast %127 : vector<8x128xf32> to vector<1x8x128xf32>
    tpu.vector_store %arg11[%c0_78, %c0_79, %c0_80], %130 {strides = array<i32>} : memref<1x8x128xf32, #tpu.memory_space<vmem>>, vector<1x8x128xf32>,
    return
  }
  func.func @transform_0(%arg0: i32) -> (i32, i32, i32) {
    %c0_i32 = arith.constant 0 : i32
    %c0_i32_0 = arith.constant 0 : i32
    %c0_i32_1 = arith.constant 0 : i32
    return %arg0, %c0_i32, %c0_i32_0 : i32, i32, i32
  }
  func.func @transform_1(%arg0: i32) -> (i32, i32) {
    %c0_i32 = arith.constant 0 : i32
    %c0_i32_0 = arith.constant 0 : i32
    %c0_i32_1 = arith.constant 0 : i32
    return %c0_i32, %c0_i32_0 : i32, i32
  }
  func.func @transform_2(%arg0: i32) -> (i32, i32) {
    %c0_i32 = arith.constant 0 : i32
    %c0_i32_0 = arith.constant 0 : i32
    %c0_i32_1 = arith.constant 0 : i32
    return %c0_i32, %c0_i32_0 : i32, i32
  }
  func.func @transform_3(%arg0: i32) -> (i32, i32) {
    %c0_i32 = arith.constant 0 : i32
    %c0_i32_0 = arith.constant 0 : i32
    %c0_i32_1 = arith.constant 0 : i32
    return %c0_i32, %c0_i32_0 : i32, i32
  }
  func.func @transform_4(%arg0: i32) -> (i32, i32, i32) {
    %c0_i32 = arith.constant 0 : i32
    %c0_i32_0 = arith.constant 0 : i32
    %c0_i32_1 = arith.constant 0 : i32
    %c0_i32_2 = arith.constant 0 : i32
    return %c0_i32, %c0_i32_0, %c0_i32_1 : i32, i32, i32
  }
  func.func @transform_5(%arg0: i32) -> (i32, i32, i32) {
    %c0_i32 = arith.constant 0 : i32
    %c0_i32_0 = arith.constant 0 : i32
    %c0_i32_1 = arith.constant 0 : i32
    %c0_i32_2 = arith.constant 0 : i32
    return %c0_i32, %c0_i32_0, %c0_i32_1 : i32, i32, i32
  }
  func.func @transform_6(%arg0: i32) -> (i32, i32, i32) {
    %c0_i32 = arith.constant 0 : i32
    %c0_i32_0 = arith.constant 0 : i32
    %c0_i32_1 = arith.constant 0 : i32
    %c0_i32_2 = arith.constant 0 : i32
    return %c0_i32, %c0_i32_0, %c0_i32_1 : i32, i32, i32
  }
  func.func @transform_7(%arg0: i32) -> (i32, i32, i32) {
    %c0_i32 = arith.constant 0 : i32
    %c0_i32_0 = arith.constant 0 : i32
    %c0_i32_1 = arith.constant 0 : i32
    %c0_i32_2 = arith.constant 0 : i32
    return %c0_i32, %c0_i32_0, %c0_i32_1 : i32, i32, i32
  }
  func.func @transform_8(%arg0: i32) -> (i32, i32) {
    %c0_i32 = arith.constant 0 : i32
    %c0_i32_0 = arith.constant 0 : i32
    %c0_i32_1 = arith.constant 0 : i32
    return %c0_i32, %c0_i32_0 : i32, i32
  }
  func.func @transform_9(%arg0: i32) -> (i32, i32) {
    %c0_i32 = arith.constant 0 : i32
    %c0_i32_0 = arith.constant 0 : i32
    %c0_i32_1 = arith.constant 0 : i32
    return %c0_i32, %c0_i32_0 : i32, i32
  }
  func.func @transform_10(%arg0: i32) -> (i32, i32, i32) {
    %c0_i32 = arith.constant 0 : i32
    %c0_i32_0 = arith.constant 0 : i32
    %c0_i32_1 = arith.constant 0 : i32
    return %arg0, %c0_i32, %c0_i32_0 : i32, i32, i32
  }
}

</mosaic_0001>

<bundles_post_ra>
// kernel: tpu_custom_call.1
= control target key start
LH: loop header
LB: loop body
LE: loop exit
PB: predicated region body
PF: predicated region fallthrough
CT: control target
= control target key end

     0   :  { %6 = vsyncpa [#allocation3], 0  ;;  %s106_s0 = inlined_call_operand.hbm [shape: f32[8,128], index: 0, kind: input, shape index: {}]   ;;  %s107_s1 = inlined_call_operand.hbm [shape: f32[8,128], index: 1, kind: output, shape index: {}]  }
   0x1   :  { %7 = vsyncpa [#allocation4], 0  ;;  %s87_s6 = smov [#allocation2]  }
   0x2   :  { %s14_s7 = sshll.u32 %s87_s6, 4  ;;  %s15_s7 = int_to_ptr.vmem [resolvable:$true] %s14_s7 }
   0x3   :  { %s51_s8 = scalar_lea.vmem %s15_s7, 128  ;;  %p56_p1 = scmp.lt.s32.totalorder %s15_s7, %s15_s7 }
   0x4   :  { %p52_p0 = scmp.ne.s32.totalorder %s15_s7, %s51_s8  ;;  %p57_p2 = scmp.lt.s32.totalorder %s51_s8, %s51_s8 }
   0x6   :  { %p58_p3 = por %p57_p2, %p56_p1 }
   0x8   :  { %p59_p4 = pnand %p58_p3, %p52_p0 }
   0xa   :  { %62 = shalt.err (!%p59_p4)
}
   0xb   :  { %17 = dma.hbm_to_vmem [thread:$0]  %s106_s0, 128, %s15_s7, [#allocation3]  }
   0xc   :  { %83 = dma.done.wait [#allocation3], 128  }
   0xd   :  { %84 = vsyncadd [#allocation3], 4294967168  ;;  %v21_v0 = vld [vmem:[#allocation2] sm:$0xff]  ;;  %s88_s11 = smov 1   ;;  %s89_s12 = smov [#allocation5]  }
   0xe   :  { %22 = vrot.lane.b32.xlu0 %v21_v0, %s88_s11  ;;  %s31_s13 = sshll.u32 %s89_s12, 4  ;;  %s32_s13 = int_to_ptr.vmem [resolvable:$true] %s31_s13 }
   0xf   :  { %s63_s14 = scalar_lea.vmem %s32_s13, 128  ;;  %p68_p6 = scmp.lt.s32.totalorder %s32_s13, %s32_s13 }
  0x10   :  { %p64_p5 = scmp.ne.s32.totalorder %s32_s13, %s63_s14  ;;  %p69_p7 = scmp.lt.s32.totalorder %s63_s14, %s63_s14 }
  0x12   :  { %p70_p8 = por %p69_p7, %p68_p6 }
  0x14   :  { %p71_p9 = pnand %p70_p8, %p64_p5 }
  0x80   :  { %v23_v1 = vpop.permute.xlu0 %22 }
  0x81   :  { %24 = vst [vmem:[#allocation5] sm:$0xff] %v23_v1 }
  0x82   :  { %74 = shalt.err (!%p71_p9)
}
  0x83   :  { %34 = dma.vmem_to_hbm [thread:$0]  %s32_s13, 128, %s107_s1, [#allocation4]  }
  0x84   :  { %85 = dma.done.wait [#allocation4], 128  }
  0x85   :  { %86 = vsyncadd [#allocation4], 4294967168 }
  0x86   :  { %38 = vsyncpa [#allocation3], 1 }
  0x87   :  { %39 = vsyncpa [#allocation4], 1 }

// kernel: tpu_custom_call.1
= control target key start
LH: loop header
LB: loop body
LE: loop exit
PB: predicated region body
PF: predicated region fallthrough
CT: control target
= control target key end

     0   :  { %s1709_s0 = inlined_call_operand.vmem [shape: f32[2,8,128], index: 0, kind: input, shape index: {}]   ;;  %s1710_s1 = inlined_call_operand.hbm [shape: f32[1,128], index: 1, kind: input, shape index: {}]   ;;  %s1711_s2 = inlined_call_operand.vmem [shape: f32[8,8], index: 2, kind: input, shape index: {}]   ;;  %s1712_s3 = inlined_call_operand.vmem [shape: f32[8,1], index: 3, kind: input, shape index: {}]   ;;  %s1713_s4 = inlined_call_operand.vmem [shape: f32[3,8,24], index: 4, kind: input, shape index: {}]   ;;  %s1714_s5 = inlined_call_operand.vmem [shape: f32[3,8,1], index: 5, kind: input, shape index: {}]   ;;  %s1715_s6 = inlined_call_operand.vmem [shape: f32[3,8,8], index: 6, kind: input, shape index: {}]   ;;  %s1716_s7 = inlined_call_operand.vmem [shape: f32[3,8,1], index: 7, kind: input, shape index: {}]   ;;  %s1717_s8 = inlined_call_operand.vmem [shape: f32[8,8], index: 8, kind: input, shape index: {}]   ;;  %s1718_s9 = inlined_call_operand.vmem [shape: f32[8,1], index: 9, kind: input, shape index: {}]   ;;  %s1719_s10 = inlined_call_operand.hbm [shape: f32[2,8,128], index: 10, kind: output, shape index: {}]  }
   0x1   :  { %1720 = sst [smem:[#allocation9_spill]] %s1709_s0 }
   0x2   :  { %15 = vsyncpa [#allocation4], 0 }
   0x3   :  { %16 = vsyncpa [#allocation5], 0 }
   0x4   :  { %18 = vsyncpa [#allocation5 + $0x1], 0  ;;  %s1497_s13 = smov 0   ;;  %s1499_s14 = smov 0  }
   0x5   :  { %s1501_s15 = smov 0   ;;  %s1503_s16 = smov 0  }
   0x6 LB: > { %s1518_s17 = sadd.s32 4294967295, %s1429_s16   ;;  %s1169_s18 = sadd.s32 4294967294, %s1429_s16   ;;  %s1429_s16 = sphi %s1503_s16, %s1728_s16   ;;  %s1425_s15 = sphi %s1501_s15, %s1727_s15   ;;  %s1421_s14 = sphi %s1499_s14, %s1726_s14   ;;  %s1417_s13 = sphi %s1497_s13, %s1725_s13  }
   0x7   : > { %s1522_s19 = sadd.s32 1, %s1429_s16   ;;  %s246_s20 = sadd.s32 1, %s1425_s15 }
   0x8   : > { %s243_s21 = ssub.s32 %s1429_s16, %s1522_s19  ;;  %p256_p0 = scmp.ne.s32.totalorder %s1425_s15, %s1421_s14 }
   0x9   : > { %p244_p1 = scmp.eq.s32.totalorder %s243_s21, 0  ;;  %p257_p2 = scmp.eq.s32.totalorder %s1518_s17, 1 }
   0xa   : > { %p262_p3 = scmp.ne.s32.totalorder %s1421_s14, %s1417_s13  ;;  %p263_p4 = scmp.eq.s32.totalorder %s1169_s18, 1 }
   0xb   : > { %s1533_s22 = scalar_select %p244_p1, %s1425_s15, %s246_s20  }
   0xc   : > { %p1535_p5 = por %p257_p2, %p256_p0  ;;  %p1539_p6 = por %p263_p4, %p262_p3 }
   0xd   : > { %p1170_p7 = scmp.ge.s32.totalorder %s1429_s16, 1  ;;  %p270_p8 = scmp.lt.s32.totalorder %s1429_s16, 3 }
   0xe   : > { %p1292_p9 = scmp.eq.s32.totalorder %s1518_s17, 0  ;;  %s1431_s26 = smov [#allocation3]  }
   0xf   : > { %p1546_p10 = pnand %p1170_p7, %p270_p8  ;;  %s283_s27 = sshll.u32 %s1431_s26, 4  ;;  %s284_s27 = int_to_ptr.vmem [resolvable:$true] %s283_s27 }
  0x10   : > { %s1350_s28 = scalar_lea.vmem %s284_s27, 16  ;;  %s1357_s29 = scalar_lea.vmem %s284_s27, 32 }
  0x11   : > { %p1284_p11 = pneg %p1546_p10  ;;  %p1351_p0 = scmp.ne.s32.totalorder %s284_s27, %s1350_s28 }
  0x12   : > { %p1358_p3 = scmp.lt.s32.totalorder %s284_s27, %s284_s27  ;;  %p1359_p4 = scmp.lt.s32.totalorder %s1357_s29, %s1350_s28 }
  0x13   : > { %p1285_p12 = pnand %p1292_p9, %p1284_p11 }
  0x14   : > { %p1360_p7 = por %p1359_p4, %p1358_p3 }
  0x15   : > { %p1341_p13 = pneg %p1285_p12 }
  0x17   : > { %p1353_p1 = pnand %p1351_p0, %p1341_p13 }
  0x19   : > { %p1354_p2 = pneg %p1353_p1 }
  0x1b   : > { %p1361_p8 = pnand %p1360_p7, %p1354_p2 }
  0x1d   : > { %1364 = shalt.err (!%p1361_p8)
}
  0x1e   : > { %1287 = dma.hbm_to_vmem [thread:$0]  (!%p1285_p12), %s1710_s1, 16, %s284_s27, [#allocation4]  }
  0x1f   : > { %327 = sbr.rel (%p1546_p10) target bundleno = 2012 (0x7dc), region = 60 }
  0x24   : > { %1408 = dma.done.wait (%p1292_p9), [#allocation4], 16  }
  0x25   : > { %1410 = vsyncadd (%p1292_p9), [#allocation4], 4294967280  ;;  %p364_p11 = scmp.lt.s32.totalorder %s1518_s17, 1  ;;  %v1432_v0 = vmov 0.0   ;;  %vm1433_vm0 = vmmov 0   ;;  %v1434_v1 = vmov 0   ;;  %v459_v13 = vlaneseq }
  0x26   : > { %1226 = vmatprep.subr.mxu1 %v1432_v0  ;;  %1228 = vmatprep.mubr.msk.f32.mxu1 %vm1433_vm0, %v1432_v0  ;;  %s1724_s0 = sld [smem:[#allocation9_spill]]  ;;  %vm377_vm1 = vcmask 64512   ;;  %v370_v3 = vld [vmem:[%s1711_s2] sm:$0xff]  ;;  %s1435_s30 = smov 1   ;;  %vm481_vm4 = vcmask 195584   ;;  %v1189_v34 = vld [vmem:[%s1716_s7 + $0x8] sm:$0xff] }
  0x27   : > { %s365_s12 = scalar_select %p364_p11, %s1518_s17, 1  ;;  %1337 = vset.pattern.permute.xlu0 %v1434_v1  ;;  %1338 = vset.pattern.permute.xlu1 %v1434_v1  ;;  %v371_v4 = vld [vmem:[%s1712_s3] sm:$0xff]  ;;  %v1593_v14 = vand.u32 127, %v459_v13  ;;  %v1186_v35 = vld [vmem:[%s1714_s5 + $0x8] sm:$0xff]  ;;  %v1197_v55 = vld [vmem:[%s1716_s7 + $0x10] sm:$0xff] }
  0x28   : > { %1240 = vmatprep.subr.mxu0 %v1432_v0  ;;  %1242 = vmatprep.mubr.msk.f32.mxu0 %vm1433_vm0, %v1432_v0  ;;  %v1584_v6 = vld [vmem:[#allocation3] ss:$0 sm:$0xff]  ;;  %s1436_s11 = smov 127   ;;  %s1437_s29 = smov 2   ;;  %v1185_v42 = vld [vmem:[%s1713_s4 + $0x8] sm:$0xff]  ;;  %v1194_v56 = vld [vmem:[%s1714_s5 + $0x10] sm:$0xff] }
  0x29   : > { %s1176_s18 = sshll.u32 %s365_s12, 3  ;;  %374 = vperm.xlu0 %1337, %v371_v4   ;;  %v557_v11 = vld [vmem:[%s1716_s7] sm:$0xff]  ;;  %vm465_vm2 = vcmp.lt.s32.totalorder %v1593_v14, 127  ;;  %vm462_vm3 = vcmp.ge.s32.totalorder %v1593_v14, 1  ;;  %vm643_vm5 = vcmp.lt.s32.totalorder %v1593_v14, 126  ;;  %vm640_vm6 = vcmp.ge.s32.totalorder %v1593_v14, 2 }
  0x2a   : > { %v475_v12 = vld [vmem:[%s1714_s5] sm:$0xff]  ;;  %v1180_v15 = vsel %vm465_vm2, 1.0, %v1432_v0  ;;  %v1179_v18 = vsel %vm462_vm3, 1.0, %v1432_v0  ;;  %v1184_v36 = vsel %vm643_vm5, 1.0, %v1432_v0  ;;  %v1183_v39 = vsel %vm640_vm6, 1.0, %v1432_v0  ;;  %v1188_v48 = vld [vmem:[%s1715_s6 + $0x8] sm:$0xff] }
  0x2b   : > { %v474_v21 = vld [vmem:[%s1713_s4] sm:$0xff]  ;;  %s1439_s28 = smov 4   ;;  %vm824_vm7 = vcmp.lt.s32.totalorder %v1593_v14, 124  ;;  %vm821_vm8 = vcmp.ge.s32.totalorder %v1593_v14, 4  ;;  %v1193_v1 = vld [vmem:[%s1713_s4 + $0x10] sm:$0xff] }
  0x2c   : > { %s367_s25 = scalar_lea.vmem %s1724_s0, %s1176_s18  ;;  %v556_v27 = vld [vmem:[%s1715_s6] sm:$0xff]  ;;  %v1192_v58 = vsel %vm824_vm7, 1.0, %v1432_v0  ;;  %v1191_v61 = vsel %vm821_vm8, 1.0, %v1432_v0  ;;  %s1201_s18 = sshll.u32 %s1518_s17, 7 }
  0x2d   : > { %v368_v2 = vld [vmem:[%s367_s25] sm:$0xff]  ;;  %s1096_s27 = scalar_lea.hbm %s1719_s10, %s1201_s18 }
  0x2e   : > { %1227 = vmatpush3.msra.mxu1 %v368_v2  ;;  %v1003_v57 = vld [vmem:[%s1718_s9] sm:$0xff] }
  0x2f   : > { %1229 = vmatmul.mubr.msk.f32.vlgmr.msra.gmra.mxu1 %vm377_vm1, %v370_v3  ;;  %1231 = vmatprep.subr.mxu1 %v1432_v0 }
  0x30   : > { %1237 = vmatprep.mubr.msk.f32.mxu1 %vm1433_vm0, %v1432_v0 }
  0xa4   : > { %v375_v5 = vpop.permute.xlu0 %374 }
  0xef   : > { %v447_v7 = vpop.f32.mrf.mxu1 }
  0xf0   : > { %v448_v8 = vadd.f32 %v447_v7, %v375_v5 }
  0xf1   : > { %v1230_v9 = vpop.f32.mrf.mxu1 }
  0xf2   : > { %v457_v10 = vmul.f32 %v1584_v6, %v448_v8  ;;  %v1196_v8 = vld [vmem:[%s1715_s6 + $0x10] sm:$0xff] }
  0xf4   : > { %468 = vrot.lane.b32.xlu1 %v457_v10, %s1435_s30  ;;  %470 = vrot.lane.b32.xlu0 %v457_v10, %s1436_s11  ;;  %s1438_s30 = smov 126   ;;  %s361_s11 = sand.u32 1, %s1421_s14  }
  0xf5   : > { %s1175_s12 = sshll.u32 %s361_s11, 3 }
  0xf6   : > { %s363_s20 = scalar_lea.vmem [#allocation6], %s1175_s12 }
  0xf7   : > { %s1098_s21 = sshll.u32 %s363_s20, 4  ;;  %s1099_s21 = int_to_ptr.vmem [resolvable:$true] %s1098_s21 }
  0xf8   : > { %560 = vperm.xlu0 %1337, %v557_v11   ;;  %478 = vperm.xlu1 %1338, %v475_v12  }
 0x166   : > { %v471_v16 = vpop.permute.xlu0 %470  ;;  %v469_v19 = vpop.permute.xlu1 %468 }
 0x167   : > { %v473_v17 = vmul.f32 %v1180_v15, %v471_v16  ;;  %v472_v20 = vmul.f32 %v1179_v18, %v469_v19  ;;  %v1001_v15 = vld [vmem:[%s1717_s8] sm:$0xff] }
 0x169   : > { %1232 = vmatpush3.msra.mxu1 %v473_v17 }
 0x16a   : > { %1233 = vmatprep.subr.mxu1 %v1432_v0 }
 0x16b   : > { %1234 = vmatpush3.msra.mxu1 %v457_v10 }
 0x16c   : > { %1235 = vmatprep.subr.mxu1 %v1432_v0 }
 0x16d   : > { %1236 = vmatpush3.msra.mxu1 %v472_v20 }
 0x16e   : > { %1238 = vmatmul.mubr.msk.f32.vlgmr.msra.gmra.mxu1 %vm481_vm4, %v474_v21  ;;  %1254 = vmatprep.subr.mxu1 %v1432_v0 }
 0x16f   : > { %1256 = vmatprep.mubr.msk.f32.mxu1 %vm1433_vm0, %v1432_v0 }
 0x173   : > { %v479_v22 = vpop.permute.xlu1 %478  ;;  %v561_v28 = vpop.permute.xlu0 %560 }
 0x22e   : > { %v551_v23 = vpop.f32.mrf.mxu1 }
 0x22f   : > { %v552_v24 = vadd.f32 %v551_v23, %v479_v22 }
 0x230   : > { %v1239_v25 = vpop.f32.mrf.mxu1 }
 0x231   : > { %v555_v26 = vmax.f32 %v552_v24, 0.0 }
 0x233   : > { %1241 = vmatpush3.msra.mxu0 %v555_v26 }
 0x234   : > { %1243 = vmatmul.mubr.msk.f32.vlgmr.msra.gmra.mxu0 %vm377_vm1, %v556_v27  ;;  %1245 = vmatprep.subr.mxu0 %v1432_v0 }
 0x235   : > { %1251 = vmatprep.mubr.msk.f32.mxu0 %vm1433_vm0, %v1432_v0 }
 0x2f4   : > { %v632_v29 = vpop.f32.mrf.mxu0 }
 0x2f5   : > { %v633_v30 = vadd.f32 %v632_v29, %v561_v28 }
 0x2f6   : > { %v1244_v31 = vpop.f32.mrf.mxu0 }
 0x2f7   : > { %v636_v32 = vadd.f32 %v633_v30, %v457_v10 }
 0x2f9   : > { %v637_v33 = vmul.f32 %v1584_v6, %v636_v32 }
 0x2fb   : > { %646 = vrot.lane.b32.xlu0 %v637_v33, %s1437_s29  ;;  %648 = vrot.lane.b32.xlu1 %v637_v33, %s1438_s30  ;;  %s1440_s29 = smov 124   ;;  %s1441_s30 = smov [#allocation6]  }
 0x2fc   : > { %s1369_s17 = sshll.u32 %s1441_s30, 4  ;;  %s1370_s17 = int_to_ptr.vmem [resolvable:$false] %s1369_s17 }
 0x2fd   : > { %s1371_s12 = scalar_lea.vmem %s1370_s17, 256  ;;  %p1372_p13 = scmp.lt.s32.totalorder %s1099_s21, %s1370_s17 }
 0x2ff   : > { %741 = vperm.xlu0 %1337, %v1189_v34   ;;  %658 = vperm.xlu1 %1338, %v1186_v35  }
 0x36d   : > { %v649_v37 = vpop.permute.xlu1 %648  ;;  %v647_v40 = vpop.permute.xlu0 %646 }
 0x36e   : > { %v651_v38 = vmul.f32 %v1184_v36, %v649_v37  ;;  %v650_v41 = vmul.f32 %v1183_v39, %v647_v40 }
 0x370   : > { %1246 = vmatpush3.msra.mxu0 %v651_v38 }
 0x371   : > { %1247 = vmatprep.subr.mxu0 %v1432_v0 }
 0x372   : > { %1248 = vmatpush3.msra.mxu0 %v637_v33 }
 0x373   : > { %1249 = vmatprep.subr.mxu0 %v1432_v0 }
 0x374   : > { %1250 = vmatpush3.msra.mxu0 %v650_v41 }
 0x375   : > { %1252 = vmatmul.mubr.msk.f32.vlgmr.msra.gmra.mxu0 %vm481_vm4, %v1185_v42  ;;  %1268 = vmatprep.subr.mxu0 %v1432_v0 }
 0x376   : > { %1270 = vmatprep.mubr.msk.f32.mxu0 %vm1433_vm0, %v1432_v0 }
 0x37a   : > { %v659_v43 = vpop.permute.xlu1 %658  ;;  %v742_v49 = vpop.permute.xlu0 %741 }
 0x435   : > { %v730_v44 = vpop.f32.mrf.mxu0 }
 0x436   : > { %v731_v45 = vadd.f32 %v730_v44, %v659_v43 }
 0x437   : > { %v1253_v46 = vpop.f32.mrf.mxu0 }
 0x438   : > { %v734_v47 = vmax.f32 %v731_v45, 0.0 }
 0x43a   : > { %1255 = vmatpush3.msra.mxu1 %v734_v47 }
 0x43b   : > { %1257 = vmatmul.mubr.msk.f32.vlgmr.msra.gmra.mxu1 %vm377_vm1, %v1188_v48  ;;  %1259 = vmatprep.subr.mxu1 %v1432_v0 }
 0x43c   : > { %1265 = vmatprep.mubr.msk.f32.mxu1 %vm1433_vm0, %v1432_v0 }
 0x4fb   : > { %v813_v50 = vpop.f32.mrf.mxu1 }
 0x4fc   : > { %v814_v51 = vadd.f32 %v813_v50, %v742_v49 }
 0x4fd   : > { %v1258_v52 = vpop.f32.mrf.mxu1 }
 0x4fe   : > { %v817_v53 = vadd.f32 %v814_v51, %v637_v33 }
 0x500   : > { %v818_v54 = vmul.f32 %v1584_v6, %v817_v53 }
 0x502   : > { %827 = vrot.lane.b32.xlu0 %v818_v54, %s1439_s28  ;;  %829 = vrot.lane.b32.xlu1 %v818_v54, %s1440_s29  ;;  %s1085_s28 = scalar_lea.sflag [#allocation5], %s361_s11  ;;  %s1365_s29 = scalar_lea.vmem %s1099_s21, 128 }
 0x503   : > { %p1366_p9 = scmp.ne.s32.totalorder %s1099_s21, %s1365_s29  ;;  %p1373_p0 = scmp.lt.s32.totalorder %s1371_s12, %s1365_s29 }
 0x505   : > { %p1367_p10 = pnand %p1366_p9, %p1535_p5  ;;  %p1374_p1 = por %p1373_p0, %p1372_p13 }
 0x506   : > { %922 = vperm.xlu0 %1337, %v1197_v55   ;;  %839 = vperm.xlu1 %1338, %v1194_v56  }
 0x507   : > { %p1368_p12 = pneg %p1367_p10 }
 0x509   : > { %p1375_p2 = pnand %p1374_p1, %p1368_p12 }
 0x50a   : > { %1006 = vperm.xlu1 %1338, %v1003_v57  }
 0x574   : > { %v830_v59 = vpop.permute.xlu1 %829  ;;  %v828_v62 = vpop.permute.xlu0 %827 }
 0x575   : > { %v832_v60 = vmul.f32 %v1192_v58, %v830_v59  ;;  %v831_v63 = vmul.f32 %v1191_v61, %v828_v62 }
 0x577   : > { %1260 = vmatpush3.msra.mxu1 %v832_v60 }
 0x578   : > { %1261 = vmatprep.subr.mxu1 %v1432_v0 }
 0x579   : > { %1262 = vmatpush3.msra.mxu1 %v818_v54 }
 0x57a   : > { %1263 = vmatprep.subr.mxu1 %v1432_v0 }
 0x57b   : > { %1264 = vmatpush3.msra.mxu1 %v831_v63 }
 0x57c   : > { %1266 = vmatmul.mubr.msk.f32.vlgmr.msra.gmra.mxu1 %vm481_vm4, %v1193_v1 }
 0x581   : > { %v840_v2 = vpop.permute.xlu1 %839  ;;  %v923_v9 = vpop.permute.xlu0 %922 }
 0x585   : > { %v1007_v16 = vpop.permute.xlu1 %1006 }
 0x63c   : > { %v911_v3 = vpop.f32.mrf.mxu1 }
 0x63d   : > { %v912_v4 = vadd.f32 %v911_v3, %v840_v2 }
 0x63e   : > { %v1267_v5 = vpop.f32.mrf.mxu1 }
 0x63f   : > { %v915_v7 = vmax.f32 %v912_v4, 0.0 }
 0x641   : > { %1269 = vmatpush3.msra.mxu0 %v915_v7 }
 0x642   : > { %1271 = vmatmul.mubr.msk.f32.vlgmr.msra.gmra.mxu0 %vm377_vm1, %v1196_v8  ;;  %1273 = vmatprep.subr.mxu0 %v1432_v0 }
 0x643   : > { %1275 = vmatprep.mubr.msk.f32.mxu0 %vm1433_vm0, %v1432_v0 }
 0x702   : > { %v994_v10 = vpop.f32.mrf.mxu0 }
 0x703   : > { %v995_v11 = vadd.f32 %v994_v10, %v923_v9 }
 0x704   : > { %v1272_v12 = vpop.f32.mrf.mxu0 }
 0x705   : > { %v998_v13 = vadd.f32 %v995_v11, %v818_v54 }
 0x707   : > { %v999_v14 = vmul.f32 %v1584_v6, %v998_v13 }
 0x709   : > { %1274 = vmatpush3.msra.mxu0 %v999_v14 }
 0x70a   : > { %1276 = vmatmul.mubr.msk.f32.vlgmr.msra.gmra.mxu0 %vm377_vm1, %v1001_v15 }
 0x7ca   : > { %v1078_v17 = vpop.f32.mrf.mxu0 }
 0x7cb   : > { %v1079_v0 = vadd.f32 %v1078_v17, %v1007_v16 }
 0x7cc   : > { %v1277_v18 = vpop.f32.mrf.mxu0 }
 0x7cd   : > { %v1082_v19 = vmul.f32 %v1584_v6, %v1079_v0 }
 0x7cf   : > { %1083 = vst [vmem:[%s363_s20] sm:$0xff] %v1082_v19 }
 0x7d0   : > { %1378 = shalt.err (!%p1375_p2)
}
 0x7d1   : > { %s1379_s0 = scalar_lea.hbm %s1096_s27, 128  ;;  %s1383_s20 = scalar_lea.hbm %s1719_s10, 256 }
 0x7d2   : > { %p1380_p3 = scmp.ne.s32.totalorder %s1096_s27, %s1379_s0  ;;  %p1384_p8 = scmp.lt.s32.totalorder %s1096_s27, %s1719_s10 }
 0x7d3   : > { %p1385_p11 = scmp.lt.s32.totalorder %s1383_s20, %s1379_s0 }
 0x7d4   : > { %p1381_p4 = pnand %p1380_p3, %p1535_p5 }
 0x7d5   : > { %p1386_p9 = por %p1385_p11, %p1384_p8 }
 0x7d6   : > { %p1382_p7 = pneg %p1381_p4 }
 0x7d8   : > { %p1387_p10 = pnand %p1386_p9, %p1382_p7 }
 0x7da   : > { %1390 = shalt.err (!%p1387_p10)
}
 0x7db   : > { %1282 = dma.vmem_to_hbm [thread:$0]  (%p1535_p5), %s1099_s21, 128, %s1096_s27, %s1085_s28  }
 0x7dc PF: > { %p1294_p12 = scmp.ge.s32.totalorder %s1429_s16, 2  ;;  %s1110_s29 = sand.u32 1, %s1417_s13  }
 0x7dd   : > { %s1111_s30 = scalar_lea.sflag [#allocation5], %s1110_s29 }
 0x7de   : > { %p1289_p13 = pnand %p1294_p12, %p1539_p6 }
 0x7e0   : > { %p1290_p0 = pneg %p1289_p13 }
 0x7e2   : > { %1412 = dma.done.wait (%p1290_p0), %s1111_s30, 128  }
 0x7e3   : > { %1414 = vsyncadd (%p1290_p0), %s1111_s30, 4294967168  ;;  %p21_p1 = scmp.ge.s32.totalorder %s1522_s19, 4   ;;  %s1725_s13 = smov %s1421_s14 }
 0x7e4   : > { %s1726_s14 = smov %s1425_s15  ;;  %s1727_s15 = smov %s1533_s22 }
 0x7e5   : > { %s1728_s16 = smov %s1522_s19  ;;  %23 = sbr.rel (!%p21_p1) target bundleno = 6 (0x6), region = 108 }
 0x7ea   :  { %1116 = vsyncpa [#allocation4], 1 }
 0x7eb   :  { %1118 = vsyncpa [#allocation4 + $0x1], 1 }
 0x7ec   :  { %1119 = vsyncpa [#allocation5], 1 }
 0x7ed   :  { %1121 = vsyncpa [#allocation5 + $0x1], 1 }

</bundles_post_ra>
